<compile_context>
chip_gen: v7x
topology: tpu7x:2x2x1
jax: 0.10.0
libtpu: 0.0.40
codegen_flags: <defaults>
</compile_context>

<pallas_src>
import jax
import jax.numpy as jnp
from jax import lax
from jax.experimental import pallas as pl
from jax.experimental.pallas import tpu as pltpu

BN_EPS = 1e-5          # PyTorch BatchNorm1d default eps
_LANE = 128
_BF16_SUBLANE = 16     # sublane tile height for bfloat16


def _round_up(x, m):
    return ((x + m - 1) // m) * m


def _stage_widths(output_dim, intermediate_output_dim, final_output_dim):
    padw_s = _round_up(output_dim, _LANE)
    padw_i = _round_up(intermediate_output_dim, _LANE)
    padw_f = _round_up(final_output_dim, _LANE)
    return padw_s, padw_i, padw_f


# ------------------------------ fused kernel ------------------------------


def _make_fused_kernel(*, batch, num_mlps, input_dim, output_dim,
                       intermediate_output_dim, final_output_dim,
                       depth, final_depth):
    B, M = batch, num_mlps
    padw_s, padw_i, padw_f = _stage_widths(output_dim, intermediate_output_dim,
                                           final_output_dim)
    in_rows = _round_up(input_dim, _BF16_SUBLANE)

    def kernel(x_ref, w_ref, v_ref, out_ref):
        # Static (trace-time) cursors into the packed parameter buffers.
        w_off = [0]
        v_off = [0]

        def next_w(n_rows, n_cols):
            w = w_ref[w_off[0]:w_off[0] + n_rows, :n_cols]      # bf16
            w_off[0] += n_rows
            return w

        def next_v(n_cols):
            v = v_ref[v_off[0]:v_off[0] + 1, :n_cols]            # f32
            v_off[0] += 1
            return v

        def dot_bf16(a, w):
            # bf16 x bf16 MXU matmul with f32 accumulation.
            return jnp.dot(a.astype(jnp.bfloat16), w,
                           preferred_element_type=jnp.float32)

        def bn_relu_layer(h, width):
            # Linear + BatchNorm1d (training-mode stats, single pass) + ReLU.
            w = next_w(width, width)
            b, gamma, beta = next_v(width), next_v(width), next_v(width)
            h = dot_bf16(h, w) + b
            inv_n = 1.0 / h.shape[0]
            s1 = jnp.sum(h, axis=0, keepdims=True)
            s2 = jnp.sum(h * h, axis=0, keepdims=True)
            mean = s1 * inv_n
            var = s2 * inv_n - mean * mean
            h = (h - mean) * (lax.rsqrt(var + BN_EPS) * gamma) + beta
            return jnp.maximum(h, 0.0)

        # ---- stage 1: shared_mlp over all M*B rows (rows are m-major) ----
        x = x_ref[...]                                       # (M*B, in_rows) bf16
        h = dot_bf16(x, next_w(in_rows, padw_s)) + next_v(padw_s)
        h = jnp.maximum(h, 0.0)
        for _ in range(depth - 1):
            h = bn_relu_layer(h, padw_s)                     # (M*B, padw_s) f32

        # ---- stage 2 first Linear: the (B*M, out) -> (B, M*out) reshape is
        #      folded into a sum of per-m contiguous row-block matmuls.
        #      (A single collapsed matmul would need a sublane->lane relayout
        #      of h that costs more than the M-1 MXU setups it saves.) ----
        acc = dot_bf16(h[0:B, :], next_w(padw_s, padw_i))
        for m in range(1, M):
            acc = acc + dot_bf16(h[m * B:(m + 1) * B, :],
                                 next_w(padw_s, padw_i))
        h2 = jnp.maximum(acc + next_v(padw_i), 0.0)          # (B, padw_i) f32
        for _ in range(final_depth - 1):
            h2 = bn_relu_layer(h2, padw_i)

        # ---- final Linear (no activation), lane-dense (B, padw_f) store ----
        out = dot_bf16(h2, next_w(padw_i, padw_f)) + next_v(padw_f)
        out_ref[...] = out.astype(out_ref.dtype)

    return kernel


# --------------------------------- wrappers --------------------------------


def custom_model_forward_grouped(xg, wbuf, vbuf, *, output_dim,
                                 intermediate_output_dim, final_output_dim,
                                 depth, final_depth):
    """xg: (groups, batch, num_mlps, input_dim) f32.
    Each group is one independent forward() of the module (own BN stats).
    Returns (groups, batch, final_output_dim) f32."""
    G, B, M, input_dim = xg.shape
    padw_s, padw_i, padw_f = _stage_widths(output_dim, intermediate_output_dim,
                                           final_output_dim)
    padw_max = max(padw_s, padw_i, padw_f)
    in_rows = _round_up(input_dim, _BF16_SUBLANE)

    # Guard against packing / offset mismatches (cheap, trace-time only).
    exp_w_rows = (in_rows + (depth - 1) * padw_s + M * padw_s
                  + (final_depth - 1) * padw_i + padw_i)
    exp_v_rows = 1 + 3 * (depth - 1) + 1 + 3 * (final_depth - 1) + 1
    assert wbuf.shape == (exp_w_rows, padw_max) and wbuf.dtype == jnp.bfloat16
    assert vbuf.shape == (exp_v_rows, padw_max) and vbuf.dtype == jnp.float32

    # m-major rows per group (one tiny XLA transpose covering all G groups),
    # zero-padded along K to the bf16 sublane tile, cast to bf16 for the MXU.
    x_rows = jnp.transpose(xg, (0, 2, 1, 3)).reshape(G, M * B, input_dim)
    if in_rows != input_dim:
        x_rows = jnp.pad(x_rows, ((0, 0), (0, 0), (0, in_rows - input_dim)))
    x_rows = x_rows.astype(jnp.bfloat16)

    kernel = _make_fused_kernel(
        batch=B, num_mlps=M, input_dim=input_dim, output_dim=output_dim,
        intermediate_output_dim=intermediate_output_dim,
        final_output_dim=final_output_dim, depth=depth,
        final_depth=final_depth)

    out_padded = pl.pallas_call(
        kernel,
        out_shape=jax.ShapeDtypeStruct((G, B, padw_f), jnp.float32),
        grid=(G,),
        in_specs=[
            pl.BlockSpec((None, M * B, in_rows), lambda g: (g, 0, 0)),
            # Constant index_maps: the packed parameters are DMA'd once and
            # stay VMEM-resident across all grid steps (batch groups).
            pl.BlockSpec(wbuf.shape, lambda g: (0, 0)),
            pl.BlockSpec(vbuf.shape, lambda g: (0, 0)),
        ],
        out_specs=pl.BlockSpec((None, B, padw_f), lambda g: (g, 0, 0)),
        compiler_params=pltpu.CompilerParams(
            dimension_semantics=("arbitrary",),
            vmem_limit_bytes=32 * 1024 * 1024),
    )(x_rows, wbuf, vbuf)
    return out_padded[..., :final_output_dim]


def custom_model_forward(x, wbuf, vbuf, *, output_dim, intermediate_output_dim,
                         final_output_dim, depth, final_depth):
    """x: (batch, num_mlps, input_dim) f32 — equivalent of CustomModel.forward."""
    out = custom_model_forward_grouped(
        x[None], wbuf, vbuf, output_dim=output_dim,
        intermediate_output_dim=intermediate_output_dim,
        final_output_dim=final_output_dim, depth=depth,
        final_depth=final_depth)
    return out[0]


# ------------------------- parameter construction -------------------------


def _init_linear(key, in_d, out_d):
    kw, kb = jax.random.split(key)
    bound = 1.0 / (in_d ** 0.5)
    w = jax.random.uniform(kw, (in_d, out_d), jnp.float32, -bound, bound)
    b = jax.random.uniform(kb, (1, out_d), jnp.float32, -bound, bound)
    return w, b


def init_custom_model_params(key, input_dim, output_dim, num_mlps,
                             intermediate_output_dim, final_output_dim,
                             depth, final_depth):
    keys = jax.random.split(key, depth + final_depth + 1)
    ki = 0

    shared = []
    w, b = _init_linear(keys[ki], input_dim, output_dim); ki += 1
    shared += [w, b]
    for _ in range(depth - 1):
        w, b = _init_linear(keys[ki], output_dim, output_dim); ki += 1
        shared += [w, b, jnp.ones((1, output_dim), jnp.float32),
                   jnp.zeros((1, output_dim), jnp.float32)]

    final = []
    w, b = _init_linear(keys[ki], num_mlps * output_dim,
                        intermediate_output_dim); ki += 1
    final += [w, b]
    for _ in range(final_depth - 1):
        w, b = _init_linear(keys[ki], intermediate_output_dim,
                            intermediate_output_dim); ki += 1
        final += [w, b, jnp.ones((1, intermediate_output_dim), jnp.float32),
                  jnp.zeros((1, intermediate_output_dim), jnp.float32)]
    w, b = _init_linear(keys[ki], intermediate_output_dim, final_output_dim)
    final += [w, b]
    return shared, final


def pack_params(shared_params, final_params, *, input_dim, output_dim,
                num_mlps, intermediate_output_dim, final_output_dim,
                depth, final_depth):
    """Pack all parameters into two lane-dense buffers:
       wbuf (bf16): zero-padded weight matrices stacked along rows,
       vbuf (f32):  zero-padded bias / gamma / beta rows."""
    padw_s, padw_i, padw_f = _stage_widths(output_dim, intermediate_output_dim,
                                           final_output_dim)
    padw_max = max(padw_s, padw_i, padw_f)
    in_rows = _round_up(input_dim, _BF16_SUBLANE)

    def wblock(w, rows):
        blk = jnp.zeros((rows, padw_max), jnp.float32)
        return blk.at[:w.shape[0], :w.shape[1]].set(w.astype(jnp.float32))

    def vrow(v):
        v = jnp.asarray(v, jnp.float32).reshape(1, -1)
        row = jnp.zeros((1, padw_max), jnp.float32)
        return row.at[:, :v.shape[1]].set(v)

    w_blocks, v_rows = [], []

    # shared_mlp
    w, b = shared_params[0], shared_params[1]
    w_blocks.append(wblock(w, in_rows)); v_rows.append(vrow(b))
    idx = 2
    for _ in range(depth - 1):
        w, b, g, bt = shared_params[idx:idx + 4]; idx += 4
        w_blocks.append(wblock(w, padw_s))
        v_rows += [vrow(b), vrow(g), vrow(bt)]

    # final_projection first Linear, split per mlp (reshape fold)
    w2a, b2a = final_params[0], final_params[1]
    for m in range(num_mlps):
        w_blocks.append(wblock(w2a[m * output_dim:(m + 1) * output_dim, :],
                               padw_s))
    v_rows.append(vrow(b2a))
    idx = 2
    for _ in range(final_depth - 1):
        w, b, g, bt = final_params[idx:idx + 4]; idx += 4
        w_blocks.append(wblock(w, padw_i))
        v_rows += [vrow(b), vrow(g), vrow(bt)]
    wf, bf = final_params[idx], final_params[idx + 1]
    w_blocks.append(wblock(wf, padw_i)); v_rows.append(vrow(bf))

    wbuf = jnp.concatenate(w_blocks, axis=0).astype(jnp.bfloat16)
    vbuf = jnp.concatenate(v_rows, axis=0)
    return wbuf, vbuf


# ----------------------------- pure-JAX references -------------------------


def _reference_forward_f32(x, shared, final, *, depth, final_depth):
    """Exact f32 forward of the PyTorch module (training-mode BN)."""
    hp = lax.Precision.HIGHEST
    batch = x.shape[0]
    h = x.reshape(-1, x.shape[-1])
    h = jnp.maximum(jnp.dot(h, shared[0], precision=hp) + shared[1], 0.0)
    idx = 2
    for _ in range(depth - 1):
        w, b, g, bt = shared[idx:idx + 4]; idx += 4
        h = jnp.dot(h, w, precision=hp) + b
        mean = h.mean(0, keepdims=True)
        var = ((h - mean) ** 2).mean(0, keepdims=True)
        h = jnp.maximum((h - mean) * lax.rsqrt(var + BN_EPS) * g + bt, 0.0)
    h = h.reshape(batch, -1)
    h = jnp.maximum(jnp.dot(h, final[0], precision=hp) + final[1], 0.0)
    idx = 2
    for _ in range(final_depth - 1):
        w, b, g, bt = final[idx:idx + 4]; idx += 4
        h = jnp.dot(h, w, precision=hp) + b
        mean = h.mean(0, keepdims=True)
        var = ((h - mean) ** 2).mean(0, keepdims=True)
        h = jnp.maximum((h - mean) * lax.rsqrt(var + BN_EPS) * g + bt, 0.0)
    return jnp.dot(h, final[idx], precision=hp) + final[idx + 1]


def _reference_forward_bf16(x, shared, final, *, depth, final_depth):
    """Mimics the kernel numerics: bf16 matmul operands, f32 accumulation,
    f32 single-pass BatchNorm — used as the tight correctness check."""
    def mm(a, w):
        return jnp.dot(a.astype(jnp.bfloat16), w.astype(jnp.bfloat16),
                       preferred_element_type=jnp.float32)

    def bn(h, g, bt):
        n = h.shape[0]
        s1 = jnp.sum(h, 0, keepdims=True)
        s2 = jnp.sum(h * h, 0, keepdims=True)
        mean = s1 / n
        var = s2 / n - mean * mean
        return (h - mean) * (lax.rsqrt(var + BN_EPS) * g) + bt

    batch = x.shape[0]
    h = x.reshape(-1, x.shape[-1])
    h = jnp.maximum(mm(h, shared[0]) + shared[1], 0.0)
    idx = 2
    for _ in range(depth - 1):
        w, b, g, bt = shared[idx:idx + 4]; idx += 4
        h = jnp.maximum(bn(mm(h, w) + b, g, bt), 0.0)
    h = h.reshape(batch, -1)
    h = jnp.maximum(mm(h, final[0]) + final[1], 0.0)
    idx = 2
    for _ in range(final_depth - 1):
        w, b, g, bt = final[idx:idx + 4]; idx += 4
        h = jnp.maximum(bn(mm(h, w) + b, g, bt), 0.0)
    return mm(h, final[idx]) + final[idx + 1]


# ---------------------------------- main -----------------------------------


if __name__ == "__main__":
    # Small shapes consistent with the module structure.
    batch = 8
    groups = 3        # independent forwards streamed through one pallas_call
    input_dim = 16
    output_dim = 32
    num_mlps = 4
    intermediate_output_dim = 64
    final_output_dim = 48
    depth = 3
    final_depth = 3

    key = jax.random.PRNGKey(0)
    k_params, k_x = jax.random.split(key)

    shared_params, final_params = init_custom_model_params(
        k_params, input_dim, output_dim, num_mlps,
        intermediate_output_dim, final_output_dim, depth, final_depth)

    wbuf, vbuf = pack_params(
        shared_params, final_params,
        input_dim=input_dim, output_dim=output_dim, num_mlps=num_mlps,
        intermediate_output_dim=intermediate_output_dim,
        final_output_dim=final_output_dim, depth=depth,
        final_depth=final_depth)

    xg = jax.random.normal(
        k_x, (groups, batch, num_mlps, input_dim), jnp.float32)

    static = ("output_dim", "intermediate_output_dim", "final_output_dim",
              "depth", "final_depth")
    fwd_grouped = jax.jit(custom_model_forward_grouped, static_argnames=static)
    fwd_single = jax.jit(custom_model_forward, static_argnames=static)
    kw = dict(output_dim=output_dim,
              intermediate_output_dim=intermediate_output_dim,
              final_output_dim=final_output_dim,
              depth=depth, final_depth=final_depth)

    out_g = jax.block_until_ready(fwd_grouped(xg, wbuf, vbuf, **kw))
    out_1 = jax.block_until_ready(fwd_single(xg[0], wbuf, vbuf, **kw))

    assert out_g.shape == (groups, batch, final_output_dim), out_g.shape
    assert out_1.shape == (batch, final_output_dim), out_1.shape
    assert out_g.dtype == jnp.float32
    assert float(jnp.max(jnp.abs(out_1 - out_g[0]))) < 1e-5

    # Tight check vs. kernel-numerics reference (packing / offset bugs) and
    # loose check vs. pure-f32 reference (bf16 quantization drift).
    for g in range(groups):
        ref_bf16 = _reference_forward_bf16(
            xg[g], shared_params, final_params, depth=depth,
            final_depth=final_depth)
        ref_f32 = _reference_forward_f32(
            xg[g], shared_params, final_params, depth=depth,
            final_depth=final_depth)
        err_tight = float(jnp.max(jnp.abs(out_g[g] - ref_bf16)))
        err_f32 = float(jnp.max(jnp.abs(out_g[g] - ref_f32)))
        assert err_tight < 5e-3, f"group {g}: bf16-mimic max abs err {err_tight}"
        assert err_f32 < 1e-1, f"group {g}: f32 max abs err {err_f32}"

    print("KERNEL_OK")
</pallas_src>

<mosaic_0001>
module attributes {stable_mosaic.version = 11 : i64} {
  func.func @kernel(%arg0: i32, %arg1: memref<1x32x16xbf16, #tpu.memory_space<vmem>>, %arg2: memref<1168x128xbf16, #tpu.memory_space<vmem>>, %arg3: memref<15x128xf32, #tpu.memory_space<vmem>>, %arg4: memref<1x8x128xf32, #tpu.memory_space<vmem>>) attributes {dimension_semantics = [#tpu.dimension_semantics<arbitrary>], iteration_bounds = array<i64: 3>, scalar_prefetch = 0 : i64, scratch_operands = 0 : i64, tpu.core_type = #tpu.core_type<tc>, window_params = [{transform_indices = @transform_0, window_bounds = array<i64: 1, 32, 16>}, {pipeline_mode = #tpu.pipeline_mode<synchronous>, transform_indices = @transform_1, window_bounds = array<i64: 1168, 128>}, {pipeline_mode = #tpu.pipeline_mode<synchronous>, transform_indices = @transform_2, window_bounds = array<i64: 15, 128>}, {transform_indices = @transform_3, window_bounds = array<i64: 1, 8, 128>}]} {
    %c0 = arith.constant 0 : index
    %c0_0 = arith.constant 0 : index
    %c0_1 = arith.constant 0 : index
    %0 = vector.load %arg1[%c0, %c0_0, %c0_1] : memref<1x32x16xbf16, #tpu.memory_space<vmem>>, vector<1x32x16xbf16>
    %1 = vector.shape_cast %0 : vector<1x32x16xbf16> to vector<32x16xbf16>
    %c0_2 = arith.constant 0 : index
    %c0_3 = arith.constant 0 : index
    %2 = vector.load %arg2[%c0_2, %c0_3] : memref<1168x128xbf16, #tpu.memory_space<vmem>>, vector<16x128xbf16>
    %cst = arith.constant dense<0.000000e+00> : vector<32x128xf32>
    %3 = tpu.matmul %1, %2, %cst {dimension_numbers = #tpu.dot_dimension_numbers<[1], [0], [0], [1], [0, 0, 1, 1], [], []>} : vector<32x16xbf16>, vector<16x128xbf16>, vector<32x128xf32> -> vector<32x128xf32>
    %c0_4 = arith.constant 0 : index
    %c0_5 = arith.constant 0 : index
    %4 = vector.load %arg3[%c0_4, %c0_5] : memref<15x128xf32, #tpu.memory_space<vmem>>, vector<1x128xf32>
    %5 = vector.broadcast %4 : vector<1x128xf32> to vector<32x128xf32>
    %6 = arith.addf %3, %5 : vector<32x128xf32>
    %cst_6 = arith.constant 0.000000e+00 : f32
    %7 = vector.broadcast %cst_6 : f32 to vector<32x128xf32>
    %8 = arith.maximumf %6, %7 : vector<32x128xf32>
    %c16 = arith.constant 16 : index
    %c0_7 = arith.constant 0 : index
    %9 = vector.load %arg2[%c16, %c0_7] : memref<1168x128xbf16, #tpu.memory_space<vmem>>, vector<128x128xbf16>
    %c1 = arith.constant 1 : index
    %c0_8 = arith.constant 0 : index
    %10 = vector.load %arg3[%c1, %c0_8] : memref<15x128xf32, #tpu.memory_space<vmem>>, vector<1x128xf32>
    %c2 = arith.constant 2 : index
    %c0_9 = arith.constant 0 : index
    %11 = vector.load %arg3[%c2, %c0_9] : memref<15x128xf32, #tpu.memory_space<vmem>>, vector<1x128xf32>
    %c3 = arith.constant 3 : index
    %c0_10 = arith.constant 0 : index
    %12 = vector.load %arg3[%c3, %c0_10] : memref<15x128xf32, #tpu.memory_space<vmem>>, vector<1x128xf32>
    %13 = arith.truncf %8 : vector<32x128xf32> to vector<32x128xbf16>
    %cst_11 = arith.constant dense<0.000000e+00> : vector<32x128xf32>
    %14 = tpu.matmul %13, %9, %cst_11 {dimension_numbers = #tpu.dot_dimension_numbers<[1], [0], [0], [1], [0, 0, 1, 1], [], []>} : vector<32x128xbf16>, vector<128x128xbf16>, vector<32x128xf32> -> vector<32x128xf32>
    %15 = vector.broadcast %10 : vector<1x128xf32> to vector<32x128xf32>
    %16 = arith.addf %14, %15 : vector<32x128xf32>
    %cst_12 = arith.constant dense<0.000000e+00> : vector<128xf32>
    %17 = vector.multi_reduction <add>, %16, %cst_12 [0] : vector<32x128xf32> to vector<128xf32>
    %18 = vector.shape_cast %17 : vector<128xf32> to vector<1x128xf32>
    %19 = arith.mulf %16, %16 : vector<32x128xf32>
    %cst_13 = arith.constant dense<0.000000e+00> : vector<128xf32>
    %20 = vector.multi_reduction <add>, %19, %cst_13 [0] : vector<32x128xf32> to vector<128xf32>
    %21 = vector.shape_cast %20 : vector<128xf32> to vector<1x128xf32>
    %cst_14 = arith.constant 3.125000e-02 : f32
    %22 = vector.broadcast %cst_14 : f32 to vector<1x128xf32>
    %23 = arith.mulf %18, %22 : vector<1x128xf32>
    %cst_15 = arith.constant 3.125000e-02 : f32
    %24 = vector.broadcast %cst_15 : f32 to vector<1x128xf32>
    %25 = arith.mulf %21, %24 : vector<1x128xf32>
    %26 = arith.mulf %23, %23 : vector<1x128xf32>
    %27 = arith.subf %25, %26 : vector<1x128xf32>
    %28 = vector.broadcast %23 : vector<1x128xf32> to vector<32x128xf32>
    %29 = arith.subf %16, %28 : vector<32x128xf32>
    %cst_16 = arith.constant 9.99999974E-6 : f32
    %30 = vector.broadcast %cst_16 : f32 to vector<1x128xf32>
    %31 = arith.addf %27, %30 : vector<1x128xf32>
    %32 = math.rsqrt %31 : vector<1x128xf32>
    %33 = arith.mulf %32, %11 : vector<1x128xf32>
    %34 = vector.broadcast %33 : vector<1x128xf32> to vector<32x128xf32>
    %35 = arith.mulf %29, %34 : vector<32x128xf32>
    %36 = vector.broadcast %12 : vector<1x128xf32> to vector<32x128xf32>
    %37 = arith.addf %35, %36 : vector<32x128xf32>
    %cst_17 = arith.constant 0.000000e+00 : f32
    %38 = vector.broadcast %cst_17 : f32 to vector<32x128xf32>
    %39 = arith.maximumf %37, %38 : vector<32x128xf32>
    %c144 = arith.constant 144 : index
    %c0_18 = arith.constant 0 : index
    %40 = vector.load %arg2[%c144, %c0_18] : memref<1168x128xbf16, #tpu.memory_space<vmem>>, vector<128x128xbf16>
    %c4 = arith.constant 4 : index
    %c0_19 = arith.constant 0 : index
    %41 = vector.load %arg3[%c4, %c0_19] : memref<15x128xf32, #tpu.memory_space<vmem>>, vector<1x128xf32>
    %c5 = arith.constant 5 : index
    %c0_20 = arith.constant 0 : index
    %42 = vector.load %arg3[%c5, %c0_20] : memref<15x128xf32, #tpu.memory_space<vmem>>, vector<1x128xf32>
    %c6 = arith.constant 6 : index
    %c0_21 = arith.constant 0 : index
    %43 = vector.load %arg3[%c6, %c0_21] : memref<15x128xf32, #tpu.memory_space<vmem>>, vector<1x128xf32>
    %44 = arith.truncf %39 : vector<32x128xf32> to vector<32x128xbf16>
    %cst_22 = arith.constant dense<0.000000e+00> : vector<32x128xf32>
    %45 = tpu.matmul %44, %40, %cst_22 {dimension_numbers = #tpu.dot_dimension_numbers<[1], [0], [0], [1], [0, 0, 1, 1], [], []>} : vector<32x128xbf16>, vector<128x128xbf16>, vector<32x128xf32> -> vector<32x128xf32>
    %46 = vector.broadcast %41 : vector<1x128xf32> to vector<32x128xf32>
    %47 = arith.addf %45, %46 : vector<32x128xf32>
    %cst_23 = arith.constant dense<0.000000e+00> : vector<128xf32>
    %48 = vector.multi_reduction <add>, %47, %cst_23 [0] : vector<32x128xf32> to vector<128xf32>
    %49 = vector.shape_cast %48 : vector<128xf32> to vector<1x128xf32>
    %50 = arith.mulf %47, %47 : vector<32x128xf32>
    %cst_24 = arith.constant dense<0.000000e+00> : vector<128xf32>
    %51 = vector.multi_reduction <add>, %50, %cst_24 [0] : vector<32x128xf32> to vector<128xf32>
    %52 = vector.shape_cast %51 : vector<128xf32> to vector<1x128xf32>
    %cst_25 = arith.constant 3.125000e-02 : f32
    %53 = vector.broadcast %cst_25 : f32 to vector<1x128xf32>
    %54 = arith.mulf %49, %53 : vector<1x128xf32>
    %cst_26 = arith.constant 3.125000e-02 : f32
    %55 = vector.broadcast %cst_26 : f32 to vector<1x128xf32>
    %56 = arith.mulf %52, %55 : vector<1x128xf32>
    %57 = arith.mulf %54, %54 : vector<1x128xf32>
    %58 = arith.subf %56, %57 : vector<1x128xf32>
    %59 = vector.broadcast %54 : vector<1x128xf32> to vector<32x128xf32>
    %60 = arith.subf %47, %59 : vector<32x128xf32>
    %cst_27 = arith.constant 9.99999974E-6 : f32
    %61 = vector.broadcast %cst_27 : f32 to vector<1x128xf32>
    %62 = arith.addf %58, %61 : vector<1x128xf32>
    %63 = math.rsqrt %62 : vector<1x128xf32>
    %64 = arith.mulf %63, %42 : vector<1x128xf32>
    %65 = vector.broadcast %64 : vector<1x128xf32> to vector<32x128xf32>
    %66 = arith.mulf %60, %65 : vector<32x128xf32>
    %67 = vector.broadcast %43 : vector<1x128xf32> to vector<32x128xf32>
    %68 = arith.addf %66, %67 : vector<32x128xf32>
    %cst_28 = arith.constant 0.000000e+00 : f32
    %69 = vector.broadcast %cst_28 : f32 to vector<32x128xf32>
    %70 = arith.maximumf %68, %69 : vector<32x128xf32>
    %71 = vector.extract_strided_slice %70 {offsets = [0, 0], sizes = [8, 128], strides = [1, 1]} : vector<32x128xf32> to vector<8x128xf32>
    %c272 = arith.constant 272 : index
    %c0_29 = arith.constant 0 : index
    %72 = vector.load %arg2[%c272, %c0_29] : memref<1168x128xbf16, #tpu.memory_space<vmem>>, vector<128x128xbf16>
    %73 = arith.truncf %71 : vector<8x128xf32> to vector<8x128xbf16>
    %cst_30 = arith.constant dense<0.000000e+00> : vector<8x128xf32>
    %74 = tpu.matmul %73, %72, %cst_30 {dimension_numbers = #tpu.dot_dimension_numbers<[1], [0], [0], [1], [0, 0, 1, 1], [], []>} : vector<8x128xbf16>, vector<128x128xbf16>, vector<8x128xf32> -> vector<8x128xf32>
    %75 = vector.extract_strided_slice %70 {offsets = [8, 0], sizes = [8, 128], strides = [1, 1]} : vector<32x128xf32> to vector<8x128xf32>
    %c400 = arith.constant 400 : index
    %c0_31 = arith.constant 0 : index
    %76 = vector.load %arg2[%c400, %c0_31] : memref<1168x128xbf16, #tpu.memory_space<vmem>>, vector<128x128xbf16>
    %77 = arith.truncf %75 : vector<8x128xf32> to vector<8x128xbf16>
    %cst_32 = arith.constant dense<0.000000e+00> : vector<8x128xf32>
    %78 = tpu.matmul %77, %76, %cst_32 {dimension_numbers = #tpu.dot_dimension_numbers<[1], [0], [0], [1], [0, 0, 1, 1], [], []>} : vector<8x128xbf16>, vector<128x128xbf16>, vector<8x128xf32> -> vector<8x128xf32>
    %79 = arith.addf %74, %78 : vector<8x128xf32>
    %80 = vector.extract_strided_slice %70 {offsets = [16, 0], sizes = [8, 128], strides = [1, 1]} : vector<32x128xf32> to vector<8x128xf32>
    %c528 = arith.constant 528 : index
    %c0_33 = arith.constant 0 : index
    %81 = vector.load %arg2[%c528, %c0_33] : memref<1168x128xbf16, #tpu.memory_space<vmem>>, vector<128x128xbf16>
    %82 = arith.truncf %80 : vector<8x128xf32> to vector<8x128xbf16>
    %cst_34 = arith.constant dense<0.000000e+00> : vector<8x128xf32>
    %83 = tpu.matmul %82, %81, %cst_34 {dimension_numbers = #tpu.dot_dimension_numbers<[1], [0], [0], [1], [0, 0, 1, 1], [], []>} : vector<8x128xbf16>, vector<128x128xbf16>, vector<8x128xf32> -> vector<8x128xf32>
    %84 = arith.addf %79, %83 : vector<8x128xf32>
    %85 = vector.extract_strided_slice %70 {offsets = [24, 0], sizes = [8, 128], strides = [1, 1]} : vector<32x128xf32> to vector<8x128xf32>
    %c656 = arith.constant 656 : index
    %c0_35 = arith.constant 0 : index
    %86 = vector.load %arg2[%c656, %c0_35] : memref<1168x128xbf16, #tpu.memory_space<vmem>>, vector<128x128xbf16>
    %87 = arith.truncf %85 : vector<8x128xf32> to vector<8x128xbf16>
    %cst_36 = arith.constant dense<0.000000e+00> : vector<8x128xf32>
    %88 = tpu.matmul %87, %86, %cst_36 {dimension_numbers = #tpu.dot_dimension_numbers<[1], [0], [0], [1], [0, 0, 1, 1], [], []>} : vector<8x128xbf16>, vector<128x128xbf16>, vector<8x128xf32> -> vector<8x128xf32>
    %89 = arith.addf %84, %88 : vector<8x128xf32>
    %c7 = arith.constant 7 : index
    %c0_37 = arith.constant 0 : index
    %90 = vector.load %arg3[%c7, %c0_37] : memref<15x128xf32, #tpu.memory_space<vmem>>, vector<1x128xf32>
    %91 = vector.broadcast %90 : vector<1x128xf32> to vector<8x128xf32>
    %92 = arith.addf %89, %91 : vector<8x128xf32>
    %cst_38 = arith.constant 0.000000e+00 : f32
    %93 = vector.broadcast %cst_38 : f32 to vector<8x128xf32>
    %94 = arith.maximumf %92, %93 : vector<8x128xf32>
    %c784 = arith.constant 784 : index
    %c0_39 = arith.constant 0 : index
    %95 = vector.load %arg2[%c784, %c0_39] : memref<1168x128xbf16, #tpu.memory_space<vmem>>, vector<128x128xbf16>
    %c8 = arith.constant 8 : index
    %c0_40 = arith.constant 0 : index
    %96 = vector.load %arg3[%c8, %c0_40] : memref<15x128xf32, #tpu.memory_space<vmem>>, vector<1x128xf32>
    %c9 = arith.constant 9 : index
    %c0_41 = arith.constant 0 : index
    %97 = vector.load %arg3[%c9, %c0_41] : memref<15x128xf32, #tpu.memory_space<vmem>>, vector<1x128xf32>
    %c10 = arith.constant 10 : index
    %c0_42 = arith.constant 0 : index
    %98 = vector.load %arg3[%c10, %c0_42] : memref<15x128xf32, #tpu.memory_space<vmem>>, vector<1x128xf32>
    %99 = arith.truncf %94 : vector<8x128xf32> to vector<8x128xbf16>
    %cst_43 = arith.constant dense<0.000000e+00> : vector<8x128xf32>
    %100 = tpu.matmul %99, %95, %cst_43 {dimension_numbers = #tpu.dot_dimension_numbers<[1], [0], [0], [1], [0, 0, 1, 1], [], []>} : vector<8x128xbf16>, vector<128x128xbf16>, vector<8x128xf32> -> vector<8x128xf32>
    %101 = vector.broadcast %96 : vector<1x128xf32> to vector<8x128xf32>
    %102 = arith.addf %100, %101 : vector<8x128xf32>
    %cst_44 = arith.constant dense<0.000000e+00> : vector<128xf32>
    %103 = vector.multi_reduction <add>, %102, %cst_44 [0] : vector<8x128xf32> to vector<128xf32>
    %104 = vector.shape_cast %103 : vector<128xf32> to vector<1x128xf32>
    %105 = arith.mulf %102, %102 : vector<8x128xf32>
    %cst_45 = arith.constant dense<0.000000e+00> : vector<128xf32>
    %106 = vector.multi_reduction <add>, %105, %cst_45 [0] : vector<8x128xf32> to vector<128xf32>
    %107 = vector.shape_cast %106 : vector<128xf32> to vector<1x128xf32>
    %cst_46 = arith.constant 1.250000e-01 : f32
    %108 = vector.broadcast %cst_46 : f32 to vector<1x128xf32>
    %109 = arith.mulf %104, %108 : vector<1x128xf32>
    %cst_47 = arith.constant 1.250000e-01 : f32
    %110 = vector.broadcast %cst_47 : f32 to vector<1x128xf32>
    %111 = arith.mulf %107, %110 : vector<1x128xf32>
    %112 = arith.mulf %109, %109 : vector<1x128xf32>
    %113 = arith.subf %111, %112 : vector<1x128xf32>
    %114 = vector.broadcast %109 : vector<1x128xf32> to vector<8x128xf32>
    %115 = arith.subf %102, %114 : vector<8x128xf32>
    %cst_48 = arith.constant 9.99999974E-6 : f32
    %116 = vector.broadcast %cst_48 : f32 to vector<1x128xf32>
    %117 = arith.addf %113, %116 : vector<1x128xf32>
    %118 = math.rsqrt %117 : vector<1x128xf32>
    %119 = arith.mulf %118, %97 : vector<1x128xf32>
    %120 = vector.broadcast %119 : vector<1x128xf32> to vector<8x128xf32>
    %121 = arith.mulf %115, %120 : vector<8x128xf32>
    %122 = vector.broadcast %98 : vector<1x128xf32> to vector<8x128xf32>
    %123 = arith.addf %121, %122 : vector<8x128xf32>
    %cst_49 = arith.constant 0.000000e+00 : f32
    %124 = vector.broadcast %cst_49 : f32 to vector<8x128xf32>
    %125 = arith.maximumf %123, %124 : vector<8x128xf32>
    %c912 = arith.constant 912 : index
    %c0_50 = arith.constant 0 : index
    %126 = vector.load %arg2[%c912, %c0_50] : memref<1168x128xbf16, #tpu.memory_space<vmem>>, vector<128x128xbf16>
    %c11 = arith.constant 11 : index
    %c0_51 = arith.constant 0 : index
    %127 = vector.load %arg3[%c11, %c0_51] : memref<15x128xf32, #tpu.memory_space<vmem>>, vector<1x128xf32>
    %c12 = arith.constant 12 : index
    %c0_52 = arith.constant 0 : index
    %128 = vector.load %arg3[%c12, %c0_52] : memref<15x128xf32, #tpu.memory_space<vmem>>, vector<1x128xf32>
    %c13 = arith.constant 13 : index
    %c0_53 = arith.constant 0 : index
    %129 = vector.load %arg3[%c13, %c0_53] : memref<15x128xf32, #tpu.memory_space<vmem>>, vector<1x128xf32>
    %130 = arith.truncf %125 : vector<8x128xf32> to vector<8x128xbf16>
    %cst_54 = arith.constant dense<0.000000e+00> : vector<8x128xf32>
    %131 = tpu.matmul %130, %126, %cst_54 {dimension_numbers = #tpu.dot_dimension_numbers<[1], [0], [0], [1], [0, 0, 1, 1], [], []>} : vector<8x128xbf16>, vector<128x128xbf16>, vector<8x128xf32> -> vector<8x128xf32>
    %132 = vector.broadcast %127 : vector<1x128xf32> to vector<8x128xf32>
    %133 = arith.addf %131, %132 : vector<8x128xf32>
    %cst_55 = arith.constant dense<0.000000e+00> : vector<128xf32>
    %134 = vector.multi_reduction <add>, %133, %cst_55 [0] : vector<8x128xf32> to vector<128xf32>
    %135 = vector.shape_cast %134 : vector<128xf32> to vector<1x128xf32>
    %136 = arith.mulf %133, %133 : vector<8x128xf32>
    %cst_56 = arith.constant dense<0.000000e+00> : vector<128xf32>
    %137 = vector.multi_reduction <add>, %136, %cst_56 [0] : vector<8x128xf32> to vector<128xf32>
    %138 = vector.shape_cast %137 : vector<128xf32> to vector<1x128xf32>
    %cst_57 = arith.constant 1.250000e-01 : f32
    %139 = vector.broadcast %cst_57 : f32 to vector<1x128xf32>
    %140 = arith.mulf %135, %139 : vector<1x128xf32>
    %cst_58 = arith.constant 1.250000e-01 : f32
    %141 = vector.broadcast %cst_58 : f32 to vector<1x128xf32>
    %142 = arith.mulf %138, %141 : vector<1x128xf32>
    %143 = arith.mulf %140, %140 : vector<1x128xf32>
    %144 = arith.subf %142, %143 : vector<1x128xf32>
    %145 = vector.broadcast %140 : vector<1x128xf32> to vector<8x128xf32>
    %146 = arith.subf %133, %145 : vector<8x128xf32>
    %cst_59 = arith.constant 9.99999974E-6 : f32
    %147 = vector.broadcast %cst_59 : f32 to vector<1x128xf32>
    %148 = arith.addf %144, %147 : vector<1x128xf32>
    %149 = math.rsqrt %148 : vector<1x128xf32>
    %150 = arith.mulf %149, %128 : vector<1x128xf32>
    %151 = vector.broadcast %150 : vector<1x128xf32> to vector<8x128xf32>
    %152 = arith.mulf %146, %151 : vector<8x128xf32>
    %153 = vector.broadcast %129 : vector<1x128xf32> to vector<8x128xf32>
    %154 = arith.addf %152, %153 : vector<8x128xf32>
    %cst_60 = arith.constant 0.000000e+00 : f32
    %155 = vector.broadcast %cst_60 : f32 to vector<8x128xf32>
    %156 = arith.maximumf %154, %155 : vector<8x128xf32>
    %c1040 = arith.constant 1040 : index
    %c0_61 = arith.constant 0 : index
    %157 = vector.load %arg2[%c1040, %c0_61] : memref<1168x128xbf16, #tpu.memory_space<vmem>>, vector<128x128xbf16>
    %158 = arith.truncf %156 : vector<8x128xf32> to vector<8x128xbf16>
    %cst_62 = arith.constant dense<0.000000e+00> : vector<8x128xf32>
    %159 = tpu.matmul %158, %157, %cst_62 {dimension_numbers = #tpu.dot_dimension_numbers<[1], [0], [0], [1], [0, 0, 1, 1], [], []>} : vector<8x128xbf16>, vector<128x128xbf16>, vector<8x128xf32> -> vector<8x128xf32>
    %c14 = arith.constant 14 : index
    %c0_63 = arith.constant 0 : index
    %160 = vector.load %arg3[%c14, %c0_63] : memref<15x128xf32, #tpu.memory_space<vmem>>, vector<1x128xf32>
    %161 = vector.broadcast %160 : vector<1x128xf32> to vector<8x128xf32>
    %162 = arith.addf %159, %161 : vector<8x128xf32>
    %c0_64 = arith.constant 0 : index
    %c0_65 = arith.constant 0 : index
    %c0_66 = arith.constant 0 : index
    %163 = vector.load %arg4[%c0_64, %c0_65, %c0_66] : memref<1x8x128xf32, #tpu.memory_space<vmem>>, vector<1x8x128xf32>
    %164 = vector.shape_cast %163 : vector<1x8x128xf32> to vector<8x128xf32>
    %165 = vector.shape_cast %162 : vector<8x128xf32> to vector<1x8x128xf32>
    tpu.vector_store %arg4[%c0_64, %c0_65, %c0_66], %165 {strides = array<i32>} : memref<1x8x128xf32, #tpu.memory_space<vmem>>, vector<1x8x128xf32>,
    return
  }
  func.func @transform_0(%arg0: i32) -> (i32, i32, i32) {
    %c0_i32 = arith.constant 0 : i32
    %c0_i32_0 = arith.constant 0 : i32
    %c0_i32_1 = arith.constant 0 : i32
    return %arg0, %c0_i32, %c0_i32_0 : i32, i32, i32
  }
  func.func @transform_1(%arg0: i32) -> (i32, i32) {
    %c0_i32 = arith.constant 0 : i32
    %c0_i32_0 = arith.constant 0 : i32
    %c0_i32_1 = arith.constant 0 : i32
    return %c0_i32, %c0_i32_0 : i32, i32
  }
  func.func @transform_2(%arg0: i32) -> (i32, i32) {
    %c0_i32 = arith.constant 0 : i32
    %c0_i32_0 = arith.constant 0 : i32
    %c0_i32_1 = arith.constant 0 : i32
    return %c0_i32, %c0_i32_0 : i32, i32
  }
  func.func @transform_3(%arg0: i32) -> (i32, i32, i32) {
    %c0_i32 = arith.constant 0 : i32
    %c0_i32_0 = arith.constant 0 : i32
    %c0_i32_1 = arith.constant 0 : i32
    return %arg0, %c0_i32, %c0_i32_0 : i32, i32, i32
  }
}

</mosaic_0001>

<bundles_post_ra>
// kernel: custom_model_forward_grouped.1
= control target key start
LH: loop header
LB: loop body
LE: loop exit
PB: predicated region body
PF: predicated region fallthrough
CT: control target
= control target key end

     0   :  { %8 = vsyncpa [#allocation3], 0  ;;  %s2424_s0 = inlined_call_operand.vmem [shape: bf16[3,32,16], index: 0, kind: input, shape index: {}]   ;;  %s2425_s1 = inlined_call_operand.hbm [shape: bf16[1168,128], index: 1, kind: input, shape index: {}]   ;;  %s2426_s2 = inlined_call_operand.vmem [shape: f32[15,128], index: 2, kind: input, shape index: {}]   ;;  %s2427_s3 = inlined_call_operand.hbm [shape: f32[3,8,128], index: 3, kind: output, shape index: {}]  }
   0x1   :  { %9 = vsyncpa [#allocation4], 0 }
   0x2   :  { %11 = vsyncpa [#allocation4 + $0x1], 0  ;;  %s2168_s12 = smov 0   ;;  %s2170_s13 = smov 0  }
   0x3   :  { %s2172_s14 = smov 0   ;;  %s2174_s15 = smov 0  }
   0x4 LB: > { %s2189_s16 = sadd.s32 4294967295, %s2140_s15   ;;  %s1535_s17 = sadd.s32 4294967294, %s2140_s15   ;;  %s2140_s15 = sphi %s2174_s15, %s2443_s15   ;;  %s2136_s14 = sphi %s2172_s14, %s2442_s14   ;;  %s2132_s13 = sphi %s2170_s13, %s2441_s13   ;;  %s2128_s12 = sphi %s2168_s12, %s2440_s12  }
   0x5   : > { %s2193_s18 = sadd.s32 1, %s2140_s15   ;;  %s92_s19 = sadd.s32 1, %s2136_s14 }
   0x6   : > { %s89_s20 = ssub.s32 %s2140_s15, %s2193_s18  ;;  %p102_p0 = scmp.ne.s32.totalorder %s2136_s14, %s2132_s13 }
   0x7   : > { %p90_p1 = scmp.eq.s32.totalorder %s89_s20, 0  ;;  %p103_p2 = scmp.eq.s32.totalorder %s2189_s16, 2 }
   0x8   : > { %p108_p3 = scmp.ne.s32.totalorder %s2132_s13, %s2128_s12  ;;  %p109_p4 = scmp.eq.s32.totalorder %s1535_s17, 2 }
   0x9   : > { %s2204_s21 = scalar_select %p90_p1, %s2136_s14, %s92_s19  }
   0xa   : > { %p2206_p5 = por %p103_p2, %p102_p0  ;;  %p2210_p6 = por %p109_p4, %p108_p3 }
   0xb   : > { %p1536_p7 = scmp.ge.s32.totalorder %s2140_s15, 1  ;;  %p116_p8 = scmp.lt.s32.totalorder %s2140_s15, 4 }
   0xc   : > { %s2431_s22 = scalar_select %p2206_p5, 1, 0 }
   0xd   : > { %s2432_s23 = scalar_select %p2210_p6, 1, 0 }
   0xe   : > { %p2428_p9 = scmp.eq.s32.totalorder %s2189_s16, 0  ;;  %p2217_p10 = pnand %p1536_p7, %p116_p8 }
   0xf   : > { %s2142_s25 = smov [#allocation2]   ;;  %s2046_s30 = scalar_lea.hbm %s2425_s1, 9344 }
  0x10   : > { %s2433_s24 = scalar_select %p2217_p10, 1, 0 }
  0x11   : > { %s128_s26 = sshll.u32 %s2142_s25, 4  ;;  %p1915_p11 = pneg %p2217_p10  ;;  %s129_s26 = int_to_ptr.vmem [resolvable:$true] %s128_s26 }
  0x12   : > { %p2047_p13 = scmp.ne.s32.totalorder %s2425_s1, %s2046_s30  ;;  %p2053_p3 = scmp.lt.u32.totalorder %s2046_s30, %s2425_s1 }
  0x13   : > { %p2225_p12 = pnand %p2428_p9, %p1915_p11 }
  0x15   : > { %p2048_p0 = pneg %p2225_p12 }
  0x17   : > { %p2049_p1 = pnand %p2048_p0, %p2047_p13 }
  0x19   : > { %p2050_p2 = pneg %p2049_p1 }
  0x1b   : > { %p2055_p4 = pnand %p2053_p3, %p2050_p2 }
  0x1d   : > { %2058 = shalt.err (!%p2055_p4)
}
  0x1e   : > { %s2059_s8 = scalar_lea.vmem %s129_s26, 9344  ;;  %p2067_p9 = scmp.lt.s32.totalorder %s129_s26, %s129_s26 }
  0x1f   : > { %p2060_p7 = scmp.ne.s32.totalorder %s129_s26, %s2059_s8  ;;  %p2068_p6 = scmp.lt.s32.totalorder %s2059_s8, %s2059_s8 }
  0x21   : > { %p2062_p8 = pnand %p2060_p7, %p2048_p0  ;;  %p2069_p5 = por %p2068_p6, %p2067_p9 }
  0x23   : > { %p2063_p11 = pneg %p2062_p8 }
  0x25   : > { %p2070_p10 = pnand %p2069_p5, %p2063_p11 }
  0x27   : > { %2073 = shalt.err (!%p2070_p10)
}
  0x28   : > { %s2143_s9 = smov 64   ;;  %s2144_s10 = smov 4  }
  0x29   : > { %1918 = dma.hbm_to_vmem [thread:$0]  (!%p2225_p12), %s2425_s1, 9344, %s129_s26, [#allocation3], %s2143_s9, %s2143_s9, %s2144_s10  }
  0x2a   : > { %p2435_p13 = scmp.ne.s32.totalorder %s2433_s24, 0 }
  0x2b   : > { %p2436_p1 = scmp.eq.s32.totalorder (!%p2435_p13), %s2189_s16, 0 }
  0x2c   : > { %155 = sbr.rel (%p2435_p13) target bundleno = 1811 (0x713), region = 32 }
  0x33   : > { %2119 = dma.done.wait (%p2436_p1), [#allocation3], 9344   ;;  %p2437_p0 = pmov %p2436_p1 }
  0x34   : > { %p179_p5 = scmp.lt.s32.totalorder %s2189_s16, 2  ;;  %v1963_v0 = vld [vmem:[#allocation2] sm:$0xff]   ;;  %vm212_vm0 = vcmask 130048   ;;  %v1966_v3 = vld [vmem:[#allocation2 + $0x8] sm:$0xff]   ;;  %v1967_v4 = vld [vmem:[#allocation2 + $0x10] sm:$0xff]   ;;  %vm2146_vm1 = vmmov 0  }
  0x35   : > { %2121 = vsyncadd (%p2437_p0), [#allocation3], 4294957952  ;;  %1723 = vmatprep.subr.bf16.mxu0 %v1963_v0  ;;  %1729 = vmatprep.subr.bf16.mxu1 %v1966_v3  ;;  %v1968_v5 = vld [vmem:[#allocation2 + $0x18] sm:$0xff]   ;;  %v1969_v6 = vld [vmem:[#allocation2 + $0x20] sm:$0xff]   ;;  %s176_s10 = sand.u32 1, %s2132_s13   ;;  %p2438_p9 = scmp.ne.s32.totalorder %s2431_s22, 0 }
  0x36   : > { %s180_s19 = scalar_select %p179_p5, %s2189_s16, 2  ;;  %1724 = vmatpush3.bf16.msra.mxu0 %v1963_v0  ;;  %1730 = vmatpush3.bf16.msra.mxu1 %v1966_v3  ;;  %v1970_v7 = vld [vmem:[#allocation2 + $0x28] sm:$0xff]   ;;  %v1971_v8 = vld [vmem:[#allocation2 + $0x30] sm:$0xff]   ;;  %v1972_v9 = vld [vmem:[#allocation2 + $0x38] sm:$0xff]  }
  0x37   : > { %1731 = vmatprep.subr.bf16.mxu1 %v1967_v4  ;;  %v1973_v10 = vld [vmem:[#allocation2 + $0x40] sm:$0xff]   ;;  %v1974_v26 = vld [vmem:[#allocation2 + $0x48] sm:$0xff]   ;;  %v1975_v27 = vld [vmem:[#allocation2 + $0x50] sm:$0xff]   ;;  %s1541_s11 = sshll.u32 %s176_s10, 3  ;;  %s1451_s29 = scalar_lea.sflag [#allocation4], %s176_s10 }
  0x38   : > { %s1636_s20 = sshll.u32 %s180_s19, 4  ;;  %v1544_v11 = vld [vmem:[%s2426_s2] ss:$0 sm:$0xff]  ;;  %1749 = vmatprep.subr.bf16.mxu0 %v1974_v26  ;;  %v1976_v28 = vld [vmem:[#allocation2 + $0x58] sm:$0xff]   ;;  %v1978_v30 = vld [vmem:[#allocation2 + $0x68] sm:$0xff]   ;;  %s178_s25 = scalar_lea.vmem [#allocation5], %s1541_s11 }
  0x39   : > { %s183_s28 = scalar_lea.vmem %s2424_s0, %s1636_s20  ;;  %v1977_v29 = vld [vmem:[#allocation2 + $0x60] sm:$0xff]   ;;  %v1979_v31 = vld [vmem:[#allocation2 + $0x70] sm:$0xff]   ;;  %v1980_v32 = vld [vmem:[#allocation2 + $0x78] sm:$0xff]   ;;  %s1633_s20 = sshll.u32 %s2189_s16, 7 }
  0x3a   : > { %v1964_v1 = vld [vmem:[%s183_s28] sm:$0xff]   ;;  %v1965_v2 = vld [vmem:[%s183_s28 + $0x8] sm:$0xff]   ;;  %1732 = vmatpush3.bf16.msra.mxu1 %v1967_v4  ;;  %s1464_s27 = sshll.u32 %s178_s25, 4  ;;  %s2382_s26 = scalar_lea.hbm %s2427_s3, %s1633_s20  ;;  %s2384_s27 = int_to_ptr.vmem [resolvable:$true] %s1464_s27 }
  0x3b   : > { %1725 = vmatprep.mubr.msk.bf16.mxu0 %vm212_vm0, %v1964_v1  ;;  %1733 = vmatprep.subr.bf16.mxu1 %v1968_v5  ;;  %v1981_v33 = vld [vmem:[#allocation2 + $0x80] sm:$0xff]   ;;  %s2074_s16 = scalar_lea.vmem %s2384_s27, 128  ;;  %s2147_s30 = smov [#allocation5]  }
  0x3c   : > { %1726 = vmatmul.mubr.msk.bf16.vlgmr.msra.gmra.mrb[0].mxu0 %vm212_vm0, %v1965_v2  ;;  %v1550_v34 = vld [vmem:[%s2426_s2 + $0x1] ss:$0 sm:$0xff]  ;;  %p2075_p6 = scmp.ne.s32.totalorder %s2384_s27, %s2074_s16  ;;  %s2078_s4 = sshll.u32 %s2147_s30, 4  ;;  %s2079_s4 = int_to_ptr.vmem [resolvable:$false] %s2078_s4 }
  0x3d   : > { %1750 = vmatpush3.bf16.msra.mxu0 %v1974_v26  ;;  %s2080_s5 = scalar_lea.vmem %s2079_s4, 256  ;;  %p2081_p2 = scmp.lt.s32.totalorder %s2384_s27, %s2079_s4 }
  0x3e   : > { %1734 = vmatpush3.bf16.msra.mxu1 %v1968_v5  ;;  %1751 = vmatprep.subr.bf16.mxu0 %v1975_v27  ;;  %p2076_p10 = pnand %p2075_p6, %p2438_p9  ;;  %p2082_p3 = scmp.lt.s32.totalorder %s2080_s5, %s2074_s16 }
  0x3f   : > { %1735 = vmatprep.subr.bf16.mxu1 %v1969_v6 }
  0x40   : > { %p2077_p12 = pneg %p2076_p10  ;;  %p2083_p4 = por %p2082_p3, %p2081_p2 }
  0x41   : > { %1752 = vmatpush3.bf16.msra.mxu0 %v1975_v27 }
  0x42   : > { %1736 = vmatpush3.bf16.msra.mxu1 %v1969_v6  ;;  %1753 = vmatprep.subr.bf16.mxu0 %v1976_v28  ;;  %p2084_p7 = pnand %p2083_p4, %p2077_p12 }
  0x43   : > { %1737 = vmatprep.subr.bf16.mxu1 %v1970_v7 }
  0x45   : > { %1754 = vmatpush3.bf16.msra.mxu0 %v1976_v28 }
  0x46   : > { %1738 = vmatpush3.bf16.msra.mxu1 %v1970_v7  ;;  %1755 = vmatprep.subr.bf16.mxu0 %v1977_v29 }
  0x47   : > { %1739 = vmatprep.subr.bf16.mxu1 %v1971_v8 }
  0x49   : > { %1756 = vmatpush3.bf16.msra.mxu0 %v1977_v29 }
  0x4a   : > { %1740 = vmatpush3.bf16.msra.mxu1 %v1971_v8  ;;  %1757 = vmatprep.subr.bf16.mxu0 %v1978_v30 }
  0x4b   : > { %1741 = vmatprep.subr.bf16.mxu1 %v1972_v9 }
  0x4d   : > { %1758 = vmatpush3.bf16.msra.mxu0 %v1978_v30 }
  0x4e   : > { %1742 = vmatpush3.bf16.msra.mxu1 %v1972_v9  ;;  %1759 = vmatprep.subr.bf16.mxu0 %v1979_v31 }
  0x4f   : > { %1743 = vmatprep.subr.bf16.mxu1 %v1973_v10 }
  0x51   : > { %1760 = vmatpush3.bf16.msra.mxu0 %v1979_v31 }
  0x52   : > { %1744 = vmatpush3.bf16.msra.mxu1 %v1973_v10  ;;  %1761 = vmatprep.subr.bf16.mxu0 %v1980_v32  ;;  %v427_v10 = vlaneseq }
  0x55   : > { %1762 = vmatpush3.bf16.msra.mxu0 %v1980_v32  ;;  %v1982_v32 = vld [vmem:[#allocation2 + $0xc8] sm:$0xff]  }
  0x56   : > { %1763 = vmatprep.subr.bf16.mxu0 %v1981_v33 }
  0x59   : > { %1764 = vmatpush3.bf16.msra.mxu0 %v1981_v33  ;;  %v1983_v33 = vld [vmem:[#allocation2 + $0x88] sm:$0xff]  }
 0x10f   : > { %v1727_v12 = vpop.f32.mrb[0].mxu0 }
 0x110   : > { %v262_v13 = vadd.f32 %v1727_v12, %v1544_v11  ;;  %v253_v14 = vpop.f32.mrb[1].mxu0  ;;  %v289_v12 = vld [vmem:[%s2426_s2 + $0x2] sm:$0x1] }
 0x111   : > { %v254_v15 = vadd.f32 %v1544_v11, %v253_v14  ;;  %v1728_v16 = vpop.f32.mrb[2].mxu0 }
 0x112   : > { %v265_v17 = vadd.f32 %v1728_v16, %v1544_v11  ;;  %v256_v18 = vpop.f32.mrb[3].mxu0  ;;  %v270_v20 = vmax.f32 %v262_v13, 0.0 }
 0x113   : > { %v257_v19 = vadd.f32 %v1544_v11, %v256_v18  ;;  %v268_v22 = vmax.f32 %v254_v15, 0.0  ;;  %v428_v11 = vshrl.u32 %v427_v10, 7 }
 0x114   : > { %v271_v21 = vmax.f32 %v265_v17, 0.0  ;;  %v1559_v17 = vld [vmem:[%s2426_s2 + $0x3] ss:$0 sm:$0xff] }
 0x115   : > { %v269_v23 = vmax.f32 %v257_v19, 0.0  ;;  %v2265_v13 = vsub.s32 0, %v428_v11 }
 0x116   : > { %v292_v24 = vpack.c.bf16 %v271_v21, %v270_v20 }
 0x117   : > { %v291_v25 = vpack.c.bf16 %v269_v23, %v268_v22 }
 0x119   : > { %1745 = vmatprep.mubr.bf16.mxu1 %v291_v25 }
 0x11a   : > { %1746 = vmatmul.mubr.bf16.vlgmr.msra.gmra.mrb[0].mxu1 %v292_v24 }
 0x1ed   : > { %v1747_v35 = vpop.f32.mrb[0].mxu1 }
 0x1ee   : > { %v379_v36 = vpop.f32.mrb[1].mxu1  ;;  %v388_v40 = vadd.f32 %v1747_v35, %v1550_v34  ;;  %v1984_v35 = vld [vmem:[#allocation2 + $0xd0] sm:$0xff]  }
 0x1ef   : > { %v380_v37 = vadd.f32 %v1550_v34, %v379_v36  ;;  %v1748_v38 = vpop.f32.mrb[2].mxu1  ;;  %v1985_v36 = vld [vmem:[#allocation2 + $0x90] sm:$0xff]  }
 0x1f0   : > { %v382_v39 = vpop.f32.mrb[3].mxu1  ;;  %v391_v43 = vadd.f32 %v1748_v38, %v1550_v34  ;;  %v405_v46 = vmul.f32 %v388_v40, %v388_v40  ;;  %v1987_v38 = vld [vmem:[#allocation2 + $0x98] sm:$0xff]  }
 0x1f1   : > { %v383_v41 = vadd.f32 %v1550_v34, %v382_v39  ;;  %v403_v42 = vmul.f32 %v380_v37, %v380_v37  ;;  %v2145_v34 = vmov 0.0   ;;  %v1988_v39 = vld [vmem:[#allocation2 + $0xe0] sm:$0xff]  }
 0x1f2   : > { %v406_v49 = vmul.f32 %v391_v43, %v391_v43  ;;  %1769 = vmatprep.subr.bf16.mxu1 %v2145_v34  ;;  %1789 = vmatprep.subr.bf16.mxu0 %v2145_v34 }
 0x1f3   : > { %v394_v44 = vadd.f32 %v383_v41, %v380_v37  ;;  %v404_v45 = vmul.f32 %v383_v41, %v383_v41  ;;  %1770 = vmatpush3.bf16.msra.mxu1 %v1982_v32  ;;  %1785 = vmatprep.mubr.msk.bf16.mxu1 %vm2146_vm1, %v2145_v34 }
 0x1f4   : > { %1771 = vmatprep.subr.bf16.mxu1 %v2145_v34 }
 0x1f5   : > { %v395_v47 = vadd.f32 %v394_v44, %v388_v40  ;;  %v407_v48 = vadd.f32 %v404_v45, %v403_v42  ;;  %v1991_v42 = vld [vmem:[#allocation2 + $0xa8] sm:$0xff]   ;;  %v1993_v44 = vld [vmem:[#allocation2 + $0xb0] sm:$0xff]   ;;  %v1994_v45 = vld [vmem:[#allocation2 + $0xf8] sm:$0xff]  }
 0x1f7   : > { %v396_v50 = vadd.f32 %v395_v47, %v391_v43  ;;  %v408_v51 = vadd.f32 %v407_v48, %v405_v46  ;;  %1772 = vmatpush3.bf16.msra.mxu1 %v1984_v35  ;;  %v1995_v46 = vld [vmem:[#allocation2 + $0xb8] sm:$0xff]   ;;  %v1996_v47 = vld [vmem:[#allocation2 + $0x100] sm:$0xff]  }
 0x1f8   : > { %1773 = vmatprep.subr.bf16.mxu1 %v2145_v34  ;;  %v1997_v48 = vld [vmem:[#allocation2 + $0xc0] sm:$0xff]  }
 0x1f9   : > { %v397_v52 = vrot.slane %v396_v50, 4  ;;  %v409_v53 = vadd.f32 %v408_v51, %v406_v49  ;;  %v1560_v49 = vld [vmem:[%s2426_s2 + $0x4] ss:$0 sm:$0xff] }
 0x1fb   : > { %v398_v54 = vadd.f32 %v397_v52, %v396_v50  ;;  %v410_v55 = vrot.slane %v409_v53, 4 }
 0x1fd   : > { %v399_v56 = vrot.slane %v398_v54, 2  ;;  %v411_v57 = vadd.f32 %v410_v55, %v409_v53 }
 0x1ff   : > { %v400_v58 = vadd.f32 %v399_v56, %v398_v54  ;;  %v412_v59 = vrot.slane %v411_v57, 2 }
 0x201   : > { %v401_v60 = vrot.slane %v400_v58, 1  ;;  %v413_v61 = vadd.f32 %v412_v59, %v411_v57 }
 0x203   : > { %v402_v62 = vadd.f32 %v401_v60, %v400_v58  ;;  %v414_v63 = vrot.slane %v413_v61, 1 }
 0x205   : > { %v415_v0 = vadd.f32 %v414_v63, %v413_v61  ;;  %v416_v1 = vmul.f32 0.03125, %v402_v62 }
 0x207   : > { %v417_v2 = vmul.f32 0.03125, %v415_v0  ;;  %v418_v3 = vmul.f32 %v416_v1, %v416_v1  ;;  %v421_v4 = vsub.f32 %v383_v41, %v416_v1  ;;  %v420_v5 = vsub.f32 %v380_v37, %v416_v1  ;;  %v1986_v37 = vld [vmem:[#allocation2 + $0xd8] sm:$0xff]   ;;  %v1990_v41 = vld [vmem:[#allocation2 + $0xe8] sm:$0xff]  }
 0x208   : > { %v422_v6 = vsub.f32 %v388_v40, %v416_v1  ;;  %v423_v7 = vsub.f32 %v391_v43, %v416_v1  ;;  %1774 = vmatpush3.bf16.msra.mxu1 %v1986_v37  ;;  %v1989_v40 = vld [vmem:[#allocation2 + $0xa0] sm:$0xff]   ;;  %v1992_v43 = vld [vmem:[#allocation2 + $0xf0] sm:$0xff]  }
 0x209   : > { %v419_v8 = vsub.f32 %v417_v2, %v418_v3  ;;  %1775 = vmatprep.subr.bf16.mxu1 %v2145_v34 }
 0x20b   : > { %v424_v9 = vadd.f32 1e-05, %v419_v8 }
 0x20c   : > { %1776 = vmatpush3.bf16.msra.mxu1 %v1988_v39 }
 0x20d   : > { %2038 = vrsqrt.f32 %v424_v9  ;;  %1777 = vmatprep.subr.bf16.mxu1 %v2145_v34 }
 0x210   : > { %1778 = vmatpush3.bf16.msra.mxu1 %v1990_v41  ;;  %v1999_v41 = vld [vmem:[#allocation2 + $0x148] sm:$0xff]  }
 0x211   : > { %1779 = vmatprep.subr.bf16.mxu1 %v2145_v34 }
 0x214   : > { %1780 = vmatpush3.bf16.msra.mxu1 %v1992_v43 }
 0x215   : > { %1781 = vmatprep.subr.bf16.mxu1 %v2145_v34 }
 0x217   : > { %v2039_v14 = vpop.eup %2038 }
 0x218   : > { %v426_v15 = vmul.f32 %v2039_v14, %v289_v12  ;;  %1782 = vmatpush3.bf16.msra.mxu1 %v1994_v45  ;;  %v2001_v45 = vld [vmem:[#allocation2 + $0x150] sm:$0xff]  }
 0x219   : > { %1783 = vmatprep.subr.bf16.mxu1 %v2145_v34 }
 0x21a   : > { %v430_v16 = vrot.slane %v426_v15, %v2265_v13 }
 0x21c   : > { %v432_v18 = vmul.f32 %v430_v16, %v421_v4  ;;  %v431_v19 = vmul.f32 %v430_v16, %v420_v5  ;;  %v433_v20 = vmul.f32 %v430_v16, %v422_v6  ;;  %v434_v21 = vmul.f32 %v430_v16, %v423_v7  ;;  %1784 = vmatpush3.bf16.msra.mxu1 %v1996_v47  ;;  %v2003_v47 = vld [vmem:[#allocation2 + $0x158] sm:$0xff]  }
 0x21d   : > { %1809 = vmatprep.subr.bf16.mxu1 %v2145_v34 }
 0x21e   : > { %v439_v22 = vadd.f32 %v1559_v17, %v431_v19  ;;  %v440_v23 = vadd.f32 %v1559_v17, %v432_v18  ;;  %v441_v24 = vadd.f32 %v1559_v17, %v433_v20  ;;  %v442_v25 = vadd.f32 %v1559_v17, %v434_v21 }
 0x220   : > { %v443_v26 = vmax.f32 %v439_v22, 0.0  ;;  %v444_v27 = vmax.f32 %v440_v23, 0.0  ;;  %v445_v28 = vmax.f32 %v441_v24, 0.0  ;;  %v446_v29 = vmax.f32 %v442_v25, 0.0 }
 0x222   : > { %v466_v30 = vpack.c.bf16 %v444_v27, %v443_v26  ;;  %v467_v31 = vpack.c.bf16 %v446_v29, %v445_v28  ;;  %v464_v26 = vld [vmem:[%s2426_s2 + $0x5] sm:$0x1] }
 0x224   : > { %1765 = vmatprep.mubr.bf16.mxu0 %v466_v30  ;;  %v1569_v30 = vld [vmem:[%s2426_s2 + $0x6] ss:$0 sm:$0xff] }
 0x225   : > { %1766 = vmatmul.mubr.bf16.vlgmr.msra.gmra.mrb[4].mxu0 %v467_v31 }
 0x226   : > { %1790 = vmatpush3.bf16.msra.mxu0 %v1983_v33  ;;  %1805 = vmatprep.mubr.msk.bf16.mxu0 %vm2146_vm1, %v2145_v34 }
 0x227   : > { %1791 = vmatprep.subr.bf16.mxu0 %v2145_v34 }
 0x22a   : > { %1792 = vmatpush3.bf16.msra.mxu0 %v1985_v36 }
 0x22b   : > { %1793 = vmatprep.subr.bf16.mxu0 %v2145_v34 }
 0x22e   : > { %1794 = vmatpush3.bf16.msra.mxu0 %v1987_v38 }
 0x22f   : > { %1795 = vmatprep.subr.bf16.mxu0 %v2145_v34 }
 0x232   : > { %1796 = vmatpush3.bf16.msra.mxu0 %v1989_v40  ;;  %v1998_v40 = vld [vmem:[#allocation2 + $0x108] sm:$0xff]  }
 0x233   : > { %1797 = vmatprep.subr.bf16.mxu0 %v2145_v34 }
 0x236   : > { %1798 = vmatpush3.bf16.msra.mxu0 %v1991_v42 }
 0x237   : > { %1799 = vmatprep.subr.bf16.mxu0 %v2145_v34 }
 0x23a   : > { %1800 = vmatpush3.bf16.msra.mxu0 %v1993_v44  ;;  %v2000_v44 = vld [vmem:[#allocation2 + $0x110] sm:$0xff]  }
 0x23b   : > { %1801 = vmatprep.subr.bf16.mxu0 %v2145_v34 }
 0x23e   : > { %1802 = vmatpush3.bf16.msra.mxu0 %v1995_v46  ;;  %v2002_v46 = vld [vmem:[#allocation2 + $0x118] sm:$0xff]  }
 0x23f   : > { %1803 = vmatprep.subr.bf16.mxu0 %v2145_v34 }
 0x242   : > { %1804 = vmatpush3.bf16.msra.mxu0 %v1997_v48  ;;  %v2004_v48 = vld [vmem:[#allocation2 + $0x120] sm:$0xff]  }
 0x243   : > { %1829 = vmatprep.subr.bf16.mxu0 %v2145_v34 }
 0x2f8   : > { %v1767_v50 = vpop.f32.mrb[4].mxu0 }
 0x2f9   : > { %v554_v51 = vpop.f32.mrb[5].mxu0  ;;  %v563_v55 = vadd.f32 %v1767_v50, %v1560_v49  ;;  %v2006_v50 = vld [vmem:[#allocation2 + $0x128] sm:$0xff]  }
 0x2fa   : > { %v555_v52 = vadd.f32 %v1560_v49, %v554_v51  ;;  %v1768_v53 = vpop.f32.mrb[6].mxu0  ;;  %v2007_v51 = vld [vmem:[#allocation2 + $0x168] sm:$0xff]  }
 0x2fb   : > { %v557_v54 = vpop.f32.mrb[7].mxu0  ;;  %v566_v58 = vadd.f32 %v1768_v53, %v1560_v49  ;;  %v580_v61 = vmul.f32 %v563_v55, %v563_v55  ;;  %v2009_v53 = vld [vmem:[#allocation2 + $0x170] sm:$0xff]  }
 0x2fc   : > { %v558_v56 = vadd.f32 %v1560_v49, %v557_v54  ;;  %v578_v57 = vmul.f32 %v555_v52, %v555_v52  ;;  %v2005_v49 = vld [vmem:[#allocation2 + $0x160] sm:$0xff]   ;;  %v2010_v54 = vld [vmem:[#allocation2 + $0x138] sm:$0xff]  }
 0x2fd   : > { %v581_v0 = vmul.f32 %v566_v58, %v566_v58 }
 0x2fe   : > { %v569_v59 = vadd.f32 %v558_v56, %v555_v52  ;;  %v579_v60 = vmul.f32 %v558_v56, %v558_v56 }
 0x300   : > { %v570_v62 = vadd.f32 %v569_v59, %v563_v55  ;;  %v582_v63 = vadd.f32 %v579_v60, %v578_v57  ;;  %v2013_v59 = vld [vmem:[#allocation2 + $0x180] sm:$0xff]  }
 0x302   : > { %v571_v1 = vadd.f32 %v570_v62, %v566_v58  ;;  %v583_v2 = vadd.f32 %v582_v63, %v580_v61 }
 0x304   : > { %v572_v3 = vrot.slane %v571_v1, 4  ;;  %v584_v4 = vadd.f32 %v583_v2, %v581_v0  ;;  %v2014_v0 = vld [vmem:[#allocation2 + $0x188] sm:$0xff]   ;;  %v2016_v2 = vld [vmem:[#allocation2 + $0x198] sm:$0xff]  }
 0x306   : > { %v573_v5 = vadd.f32 %v572_v3, %v571_v1  ;;  %v585_v6 = vrot.slane %v584_v4, 4  ;;  %v2015_v1 = vld [vmem:[#allocation2 + $0x190] sm:$0xff]   ;;  %v2017_v3 = vld [vmem:[#allocation2 + $0x1a0] sm:$0xff]  }
 0x308   : > { %v574_v7 = vrot.slane %v573_v5, 2  ;;  %v586_v8 = vadd.f32 %v585_v6, %v584_v4  ;;  %v2018_v4 = vld [vmem:[#allocation2 + $0x1a8] sm:$0xff]   ;;  %v2020_v6 = vld [vmem:[#allocation2 + $0x1b8] sm:$0xff]  }
 0x30a   : > { %v575_v9 = vadd.f32 %v574_v7, %v573_v5  ;;  %v587_v10 = vrot.slane %v586_v8, 2  ;;  %v2019_v5 = vld [vmem:[#allocation2 + $0x1b0] sm:$0xff]   ;;  %v2021_v7 = vld [vmem:[#allocation2 + $0x1c0] sm:$0xff]  }
 0x30c   : > { %v576_v11 = vrot.slane %v575_v9, 1  ;;  %v588_v12 = vadd.f32 %v587_v10, %v586_v8 }
 0x30e   : > { %v577_v14 = vadd.f32 %v576_v11, %v575_v9  ;;  %v589_v15 = vrot.slane %v588_v12, 1 }
 0x310   : > { %v590_v16 = vadd.f32 %v589_v15, %v588_v12  ;;  %v591_v17 = vmul.f32 0.03125, %v577_v14 }
 0x312   : > { %v592_v18 = vmul.f32 0.03125, %v590_v16  ;;  %v593_v19 = vmul.f32 %v591_v17, %v591_v17  ;;  %v596_v20 = vsub.f32 %v558_v56, %v591_v17  ;;  %v595_v21 = vsub.f32 %v555_v52, %v591_v17  ;;  %v2008_v52 = vld [vmem:[#allocation2 + $0x130] sm:$0xff]  }
 0x313   : > { %v597_v22 = vsub.f32 %v563_v55, %v591_v17  ;;  %v598_v23 = vsub.f32 %v566_v58, %v591_v17  ;;  %v2011_v55 = vld [vmem:[#allocation2 + $0x178] sm:$0xff]   ;;  %v2012_v58 = vld [vmem:[#allocation2 + $0x140] sm:$0xff]  }
 0x314   : > { %v594_v24 = vsub.f32 %v592_v18, %v593_v19 }
 0x316   : > { %v599_v25 = vadd.f32 1e-05, %v594_v24 }
 0x318   : > { %2040 = vrsqrt.f32 %v599_v25 }
 0x322   : > { %v2041_v27 = vpop.eup %2040 }
 0x323   : > { %v601_v28 = vmul.f32 %v2041_v27, %v464_v26 }
 0x325   : > { %v605_v29 = vrot.slane %v601_v28, %v2265_v13 }
 0x327   : > { %v607_v31 = vmul.f32 %v605_v29, %v596_v20  ;;  %v606_v32 = vmul.f32 %v605_v29, %v595_v21  ;;  %v608_v33 = vmul.f32 %v605_v29, %v597_v22  ;;  %v609_v35 = vmul.f32 %v605_v29, %v598_v23  ;;  %v1602_v23 = vld [vmem:[%s2426_s2 + $0x7] ss:$0 sm:$0xff] }
 0x329   : > { %v615_v36 = vadd.f32 %v1569_v30, %v607_v31  ;;  %v614_v37 = vadd.f32 %v1569_v30, %v606_v32  ;;  %v616_v56 = vadd.f32 %v1569_v30, %v608_v33  ;;  %v617_v57 = vadd.f32 %v1569_v30, %v609_v35  ;;  %v2022_v32 = vld [vmem:[#allocation2 + $0x1c8] sm:$0xff]   ;;  %v2023_v33 = vld [vmem:[#allocation2 + $0x1d0] sm:$0xff]   ;;  %v2024_v35 = vld [vmem:[#allocation2 + $0x1d8] sm:$0xff]  }
 0x32b   : > { %v619_v38 = vmax.f32 %v615_v36, 0.0  ;;  %v618_v39 = vmax.f32 %v614_v37, 0.0  ;;  %v620_v60 = vmax.f32 %v616_v56, 0.0  ;;  %v621_v61 = vmax.f32 %v617_v57, 0.0  ;;  %v2025_v36 = vld [vmem:[#allocation2 + $0x1e0] sm:$0xff]   ;;  %v2026_v37 = vld [vmem:[#allocation2 + $0x1e8] sm:$0xff]  }
 0x32d   : > { %v655_v42 = vpack.c.bf16 %v619_v38, %v619_v38  ;;  %v638_v43 = vpack.c.bf16 %v618_v39, %v618_v39  ;;  %v848_v62 = vpack.c.bf16 %v620_v60, %v620_v60  ;;  %v954_v63 = vpack.c.bf16 %v621_v61, %v621_v61  ;;  %v2027_v38 = vld [vmem:[#allocation2 + $0x1f0] sm:$0xff]   ;;  %v2028_v39 = vld [vmem:[#allocation2 + $0x1f8] sm:$0xff]  }
 0x32f   : > { %1786 = vmatmul.mubr.bf16.vlgmr.msra.gmra.mrb[4].mxu1 %v655_v42  ;;  %1806 = vmatmul.mubr.bf16.vlgmr.msra.gmra.mrb[8].mxu0 %v638_v43 }
 0x330   : > { %1810 = vmatpush3.bf16.msra.mxu1 %v1998_v40  ;;  %1830 = vmatpush3.bf16.msra.mxu0 %v1999_v41  ;;  %v2029_v40 = vld [vmem:[#allocation2 + $0x200] sm:$0xff]   ;;  %v1603_v41 = vld [vmem:[%s2426_s2 + $0x8] ss:$0 sm:$0xff] }
 0x331   : > { %1811 = vmatprep.subr.bf16.mxu1 %v2145_v34  ;;  %1831 = vmatprep.subr.bf16.mxu0 %v2145_v34 }
 0x332   : > { %1825 = vmatprep.mubr.msk.bf16.mxu1 %vm2146_vm1, %v2145_v34  ;;  %1845 = vmatprep.mubr.msk.bf16.mxu0 %vm2146_vm1, %v2145_v34 }
 0x334   : > { %1812 = vmatpush3.bf16.msra.mxu1 %v2000_v44  ;;  %1832 = vmatpush3.bf16.msra.mxu0 %v2001_v45 }
 0x335   : > { %1813 = vmatprep.subr.bf16.mxu1 %v2145_v34  ;;  %1833 = vmatprep.subr.bf16.mxu0 %v2145_v34 }
 0x338   : > { %1814 = vmatpush3.bf16.msra.mxu1 %v2002_v46  ;;  %1834 = vmatpush3.bf16.msra.mxu0 %v2003_v47 }
 0x339   : > { %1815 = vmatprep.subr.bf16.mxu1 %v2145_v34  ;;  %1835 = vmatprep.subr.bf16.mxu0 %v2145_v34 }
 0x33c   : > { %1816 = vmatpush3.bf16.msra.mxu1 %v2004_v48  ;;  %1836 = vmatpush3.bf16.msra.mxu0 %v2005_v49 }
 0x33d   : > { %1817 = vmatprep.subr.bf16.mxu1 %v2145_v34  ;;  %1837 = vmatprep.subr.bf16.mxu0 %v2145_v34 }
 0x340   : > { %1818 = vmatpush3.bf16.msra.mxu1 %v2006_v50  ;;  %1838 = vmatpush3.bf16.msra.mxu0 %v2007_v51 }
 0x341   : > { %1819 = vmatprep.subr.bf16.mxu1 %v2145_v34  ;;  %1839 = vmatprep.subr.bf16.mxu0 %v2145_v34 }
 0x344   : > { %1820 = vmatpush3.bf16.msra.mxu1 %v2008_v52  ;;  %1840 = vmatpush3.bf16.msra.mxu0 %v2009_v53 }
 0x345   : > { %1821 = vmatprep.subr.bf16.mxu1 %v2145_v34  ;;  %1841 = vmatprep.subr.bf16.mxu0 %v2145_v34 }
 0x348   : > { %1822 = vmatpush3.bf16.msra.mxu1 %v2010_v54  ;;  %1842 = vmatpush3.bf16.msra.mxu0 %v2011_v55 }
 0x349   : > { %1823 = vmatprep.subr.bf16.mxu1 %v2145_v34  ;;  %1843 = vmatprep.subr.bf16.mxu0 %v2145_v34 }
 0x34c   : > { %1824 = vmatpush3.bf16.msra.mxu1 %v2012_v58  ;;  %1844 = vmatpush3.bf16.msra.mxu0 %v2013_v59 }
 0x34d   : > { %1849 = vmatprep.subr.bf16.mxu1 %v2145_v34  ;;  %1869 = vmatprep.subr.bf16.mxu0 %v2145_v34 }
 0x34f   : > { %1826 = vmatmul.mubr.bf16.vlgmr.msra.gmra.mrb[8].mxu1 %v848_v62  ;;  %1846 = vmatmul.mubr.bf16.vlgmr.msra.gmra.mrb[12].mxu0 %v954_v63 }
 0x350   : > { %1865 = vmatprep.mubr.msk.bf16.mxu1 %vm2146_vm1, %v2145_v34  ;;  %1885 = vmatprep.mubr.msk.bf16.mxu0 %vm2146_vm1, %v2145_v34 }
 0x351   : > { %1850 = vmatpush3.bf16.msra.mxu1 %v2014_v0  ;;  %1870 = vmatpush3.bf16.msra.mxu0 %v2022_v32 }
 0x352   : > { %1851 = vmatprep.subr.bf16.mxu1 %v2145_v34  ;;  %1871 = vmatprep.subr.bf16.mxu0 %v2145_v34 }
 0x355   : > { %1852 = vmatpush3.bf16.msra.mxu1 %v2015_v1  ;;  %1872 = vmatpush3.bf16.msra.mxu0 %v2023_v33  ;;  %v1068_v1 = vld [vmem:[%s2426_s2 + $0x9] sm:$0x1] }
 0x356   : > { %1853 = vmatprep.subr.bf16.mxu1 %v2145_v34  ;;  %1873 = vmatprep.subr.bf16.mxu0 %v2145_v34 }
 0x359   : > { %1854 = vmatpush3.bf16.msra.mxu1 %v2016_v2  ;;  %1874 = vmatpush3.bf16.msra.mxu0 %v2024_v35 }
 0x35a   : > { %1855 = vmatprep.subr.bf16.mxu1 %v2145_v34  ;;  %1875 = vmatprep.subr.bf16.mxu0 %v2145_v34 }
 0x35d   : > { %1856 = vmatpush3.bf16.msra.mxu1 %v2017_v3  ;;  %1876 = vmatpush3.bf16.msra.mxu0 %v2025_v36 }
 0x35e   : > { %1857 = vmatprep.subr.bf16.mxu1 %v2145_v34  ;;  %1877 = vmatprep.subr.bf16.mxu0 %v2145_v34 }
 0x361   : > { %1858 = vmatpush3.bf16.msra.mxu1 %v2018_v4  ;;  %1878 = vmatpush3.bf16.msra.mxu0 %v2026_v37 }
 0x362   : > { %1859 = vmatprep.subr.bf16.mxu1 %v2145_v34  ;;  %1879 = vmatprep.subr.bf16.mxu0 %v2145_v34 }
 0x365   : > { %1860 = vmatpush3.bf16.msra.mxu1 %v2019_v5  ;;  %1880 = vmatpush3.bf16.msra.mxu0 %v2027_v38 }
 0x366   : > { %1861 = vmatprep.subr.bf16.mxu1 %v2145_v34  ;;  %1881 = vmatprep.subr.bf16.mxu0 %v2145_v34 }
 0x369   : > { %1862 = vmatpush3.bf16.msra.mxu1 %v2020_v6  ;;  %1882 = vmatpush3.bf16.msra.mxu0 %v2028_v39  ;;  %v1612_v6 = vld [vmem:[%s2426_s2 + $0xa] ss:$0 sm:$0xff] }
 0x36a   : > { %1863 = vmatprep.subr.bf16.mxu1 %v2145_v34  ;;  %1883 = vmatprep.subr.bf16.mxu0 %v2145_v34 }
 0x36d   : > { %1864 = vmatpush3.bf16.msra.mxu1 %v2021_v7  ;;  %1884 = vmatpush3.bf16.msra.mxu0 %v2029_v40 }
 0x36e   : > { %1889 = vmatprep.subr.bf16.mxu1 %v2145_v34 }
 0x402   : > { %v738_v8 = vpop.f32.mrb[4].mxu1  ;;  %v826_v9 = vpop.f32.mrb[8].mxu0 }
 0x403   : > { %v827_v10 = vadd.f32 %v826_v9, %v738_v8  ;;  %v1787_v11 = vpop.f32.mrb[5].mxu1  ;;  %v1807_v12 = vpop.f32.mrb[9].mxu0 }
 0x404   : > { %v741_v14 = vpop.f32.mrb[6].mxu1  ;;  %v829_v15 = vpop.f32.mrb[10].mxu0  ;;  %v2030_v11 = vld [vmem:[#allocation2 + $0x208] sm:$0xff]   ;;  %v2031_v12 = vld [vmem:[#allocation2 + $0x210] sm:$0xff]  }
 0x405   : > { %v1788_v16 = vpop.f32.mrb[7].mxu1  ;;  %v1808_v17 = vpop.f32.mrb[11].mxu0  ;;  %v2032_v14 = vld [vmem:[#allocation2 + $0x218] sm:$0xff]   ;;  %v2033_v15 = vld [vmem:[#allocation2 + $0x220] sm:$0xff]  }
 0x406   : > { %v2034_v16 = vld [vmem:[#allocation2 + $0x228] sm:$0xff]   ;;  %v2035_v17 = vld [vmem:[#allocation2 + $0x230] sm:$0xff]  }
 0x422   : > { %v931_v18 = vpop.f32.mrb[8].mxu1  ;;  %v1037_v19 = vpop.f32.mrb[12].mxu0 }
 0x423   : > { %v937_v20 = vadd.f32 %v931_v18, %v827_v10  ;;  %v1827_v21 = vpop.f32.mrb[9].mxu1  ;;  %v1847_v22 = vpop.f32.mrb[13].mxu0  ;;  %v2036_v18 = vld [vmem:[#allocation2 + $0x238] sm:$0xff]  }
 0x424   : > { %v934_v24 = vpop.f32.mrb[10].mxu1  ;;  %v1040_v25 = vpop.f32.mrb[14].mxu0 }
 0x425   : > { %v1043_v26 = vadd.f32 %v1037_v19, %v937_v20  ;;  %v1828_v27 = vpop.f32.mrb[11].mxu1  ;;  %v1848_v28 = vpop.f32.mrb[15].mxu0  ;;  %v2037_v19 = vld [vmem:[#allocation2 + $0x240] sm:$0xff]   ;;  %v1613_v20 = vld [vmem:[%s2426_s2 + $0xb] ss:$0 sm:$0xff] }
 0x427   : > { %v1049_v29 = vadd.f32 %v1602_v23, %v1043_v26 }
 0x429   : > { %v1050_v30 = vmax.f32 %v1049_v29, 0.0 }
 0x42b   : > { %v1070_v31 = vpack.c.bf16 %v1050_v30, %v1050_v30 }
 0x42d   : > { %1866 = vmatmul.mubr.bf16.vlgmr.msra.gmra.mrb[12].mxu1 %v1070_v31 }
 0x42e   : > { %1905 = vmatprep.mubr.msk.bf16.mxu1 %vm2146_vm1, %v2145_v34  ;;  %1890 = vmatpush3.bf16.msra.mxu1 %v2030_v11 }
 0x42f   : > { %1891 = vmatprep.subr.bf16.mxu1 %v2145_v34 }
 0x432   : > { %1892 = vmatpush3.bf16.msra.mxu1 %v2031_v12 }
 0x433   : > { %1893 = vmatprep.subr.bf16.mxu1 %v2145_v34 }
 0x436   : > { %1894 = vmatpush3.bf16.msra.mxu1 %v2032_v14 }
 0x437   : > { %1895 = vmatprep.subr.bf16.mxu1 %v2145_v34 }
 0x43a   : > { %1896 = vmatpush3.bf16.msra.mxu1 %v2033_v15 }
 0x43b   : > { %1897 = vmatprep.subr.bf16.mxu1 %v2145_v34 }
 0x43e   : > { %1898 = vmatpush3.bf16.msra.mxu1 %v2034_v16 }
 0x43f   : > { %1899 = vmatprep.subr.bf16.mxu1 %v2145_v34 }
 0x442   : > { %1900 = vmatpush3.bf16.msra.mxu1 %v2035_v17 }
 0x443   : > { %1901 = vmatprep.subr.bf16.mxu1 %v2145_v34 }
 0x446   : > { %1902 = vmatpush3.bf16.msra.mxu1 %v2036_v18 }
 0x447   : > { %1903 = vmatprep.subr.bf16.mxu1 %v2145_v34 }
 0x44a   : > { %1904 = vmatpush3.bf16.msra.mxu1 %v2037_v19 }
 0x500   : > { %v1157_v42 = vpop.f32.mrb[12].mxu1 }
 0x501   : > { %v1158_v43 = vadd.f32 %v1603_v41, %v1157_v42  ;;  %v1867_v44 = vpop.f32.mrb[13].mxu1 }
 0x502   : > { %v1160_v45 = vpop.f32.mrb[14].mxu1  ;;  %v1212_v44 = vld [vmem:[%s2426_s2 + $0xc] sm:$0x1] }
 0x503   : > { %v1163_v46 = vrot.slane %v1158_v43, 4  ;;  %v1169_v47 = vmul.f32 %v1158_v43, %v1158_v43  ;;  %v1868_v48 = vpop.f32.mrb[15].mxu1 }
 0x505   : > { %v1164_v49 = vadd.f32 %v1163_v46, %v1158_v43  ;;  %v1170_v50 = vrot.slane %v1169_v47, 4 }
 0x507   : > { %v1165_v51 = vrot.slane %v1164_v49, 2  ;;  %v1171_v52 = vadd.f32 %v1170_v50, %v1169_v47 }
 0x509   : > { %v1166_v53 = vadd.f32 %v1165_v51, %v1164_v49  ;;  %v1172_v54 = vrot.slane %v1171_v52, 2  ;;  %v1622_v49 = vld [vmem:[%s2426_s2 + $0xd] ss:$0 sm:$0xff] }
 0x50b   : > { %v1167_v55 = vrot.slane %v1166_v53, 1  ;;  %v1173_v56 = vadd.f32 %v1172_v54, %v1171_v52  ;;  %v1623_v54 = vld [vmem:[%s2426_s2 + $0xe] ss:$0 sm:$0xff] }
 0x50d   : > { %v1168_v57 = vadd.f32 %v1167_v55, %v1166_v53  ;;  %v1174_v58 = vrot.slane %v1173_v56, 1 }
 0x50f   : > { %v1175_v59 = vadd.f32 %v1174_v58, %v1173_v56  ;;  %v1176_v60 = vmul.f32 0.125, %v1168_v57 }
 0x511   : > { %v1177_v61 = vmul.f32 0.125, %v1175_v59  ;;  %v1178_v62 = vmul.f32 %v1176_v60, %v1176_v60  ;;  %v1180_v4 = vsub.f32 %v1158_v43, %v1176_v60 }
 0x513   : > { %v1179_v63 = vsub.f32 %v1177_v61, %v1178_v62 }
 0x515   : > { %v1181_v0 = vadd.f32 1e-05, %v1179_v63 }
 0x517   : > { %2042 = vrsqrt.f32 %v1181_v0 }
 0x521   : > { %v2043_v2 = vpop.eup %2042 }
 0x522   : > { %v1183_v3 = vmul.f32 %v2043_v2, %v1068_v1 }
 0x524   : > { %v1187_v5 = vrot.slane %v1183_v3, %v2265_v13 }
 0x526   : > { %v1188_v7 = vmul.f32 %v1187_v5, %v1180_v4 }
 0x528   : > { %v1193_v8 = vadd.f32 %v1612_v6, %v1188_v7 }
 0x52a   : > { %v1194_v9 = vmax.f32 %v1193_v8, 0.0 }
 0x52c   : > { %v1214_v10 = vpack.c.bf16 %v1194_v9, %v1194_v9 }
 0x52e   : > { %1886 = vmatmul.mubr.bf16.vlgmr.msra.gmra.mrb[16].mxu0 %v1214_v10 }
 0x601   : > { %v1301_v21 = vpop.f32.mrb[16].mxu0 }
 0x602   : > { %v1302_v22 = vadd.f32 %v1613_v20, %v1301_v21  ;;  %v1887_v23 = vpop.f32.mrb[17].mxu0 }
 0x603   : > { %v1304_v24 = vpop.f32.mrb[18].mxu0 }
 0x604   : > { %v1307_v25 = vrot.slane %v1302_v22, 4  ;;  %v1313_v26 = vmul.f32 %v1302_v22, %v1302_v22  ;;  %v1888_v27 = vpop.f32.mrb[19].mxu0 }
 0x606   : > { %v1308_v28 = vadd.f32 %v1307_v25, %v1302_v22  ;;  %v1314_v29 = vrot.slane %v1313_v26, 4 }
 0x608   : > { %v1309_v30 = vrot.slane %v1308_v28, 2  ;;  %v1315_v31 = vadd.f32 %v1314_v29, %v1313_v26 }
 0x60a   : > { %v1310_v32 = vadd.f32 %v1309_v30, %v1308_v28  ;;  %v1316_v33 = vrot.slane %v1315_v31, 2 }
 0x60c   : > { %v1311_v35 = vrot.slane %v1310_v32, 1  ;;  %v1317_v34 = vadd.f32 %v1316_v33, %v1315_v31 }
 0x60e   : > { %v1312_v36 = vadd.f32 %v1311_v35, %v1310_v32  ;;  %v1318_v37 = vrot.slane %v1317_v34, 1 }
 0x610   : > { %v1319_v38 = vadd.f32 %v1318_v37, %v1317_v34  ;;  %v1320_v39 = vmul.f32 0.125, %v1312_v36 }
 0x612   : > { %v1321_v40 = vmul.f32 0.125, %v1319_v38  ;;  %v1322_v41 = vmul.f32 %v1320_v39, %v1320_v39  ;;  %v1324_v47 = vsub.f32 %v1302_v22, %v1320_v39 }
 0x614   : > { %v1323_v42 = vsub.f32 %v1321_v40, %v1322_v41 }
 0x616   : > { %v1325_v43 = vadd.f32 1e-05, %v1323_v42 }
 0x618   : > { %2044 = vrsqrt.f32 %v1325_v43 }
 0x622   : > { %v2045_v45 = vpop.eup %2044 }
 0x623   : > { %v1327_v46 = vmul.f32 %v2045_v45, %v1212_v44 }
 0x625   : > { %v1331_v48 = vrot.slane %v1327_v46, %v2265_v13 }
 0x627   : > { %v1332_v50 = vmul.f32 %v1331_v48, %v1324_v47 }
 0x629   : > { %v1337_v51 = vadd.f32 %v1622_v49, %v1332_v50 }
 0x62b   : > { %v1338_v52 = vmax.f32 %v1337_v51, 0.0 }
 0x62d   : > { %v1355_v53 = vpack.c.bf16 %v1338_v52, %v1338_v52 }
 0x62f   : > { %1906 = vmatmul.mubr.bf16.vlgmr.msra.gmra.mrb[16].mxu1 %v1355_v53 }
 0x702   : > { %v1443_v13 = vpop.f32.mrb[16].mxu1 }
 0x703   : > { %v1444_v55 = vadd.f32 %v1623_v54, %v1443_v13  ;;  %v1907_v56 = vpop.f32.mrb[17].mxu1 }
 0x704   : > { %v1446_v57 = vpop.f32.mrb[18].mxu1 }
 0x705   : > { %1449 = vst [vmem:[%s178_s25] sm:$0xff] %v1444_v55  ;;  %v1908_v58 = vpop.f32.mrb[19].mxu1 }
 0x706   : > { %2087 = shalt.err (!%p2084_p7)
}
 0x707   : > { %s2088_s6 = scalar_lea.hbm %s2382_s26, 128  ;;  %s2092_s9 = scalar_lea.hbm %s2427_s3, 384 }
 0x708   : > { %p2089_p8 = scmp.ne.s32.totalorder %s2382_s26, %s2088_s6  ;;  %p2093_p1 = scmp.lt.u32.totalorder %s2382_s26, %s2427_s3 }
 0x709   : > { %p2094_p0 = scmp.lt.u32.totalorder %s2092_s9, %s2088_s6  ;;  %p2096_p6 = scmp.lt.u32.totalorder %s2088_s6, %s2382_s26 }
 0x70a   : > { %p2090_p11 = pnand %p2089_p8, %p2438_p9 }
 0x70b   : > { %p2095_p5 = por %p2094_p0, %p2093_p1 }
 0x70c   : > { %p2091_p13 = pneg %p2090_p11 }
 0x70d   : > { %p2097_p10 = por %p2096_p6, %p2095_p5 }
 0x70f   : > { %p2098_p12 = pnand %p2097_p10, %p2091_p13 }
 0x711   : > { %2101 = shalt.err (!%p2098_p12)
}
 0x712   : > { %1913 = dma.vmem_to_hbm [thread:$0]  (%p2438_p9), %s2384_s27, 128, %s2382_s26, %s1451_s29  }
 0x713 PF: > { %p1925_p2 = scmp.ge.s32.totalorder %s2140_s15, 2  ;;  %s1476_s17 = sand.u32 1, %s2128_s12  }
 0x714   : > { %p2439_p3 = scmp.ne.s32.totalorder %s2432_s23, 0  ;;  %s1477_s19 = scalar_lea.sflag [#allocation4], %s1476_s17 }
 0x716   : > { %p1920_p4 = pnand %p1925_p2, %p2439_p3 }
 0x718   : > { %2123 = dma.done.wait (!%p1920_p4), %s1477_s19, 128  }
 0x719   : > { %2125 = vsyncadd (!%p1920_p4), %s1477_s19, 4294967168  ;;  %p14_p7 = scmp.ge.s32.totalorder %s2193_s18, 5   ;;  %s2440_s12 = smov %s2132_s13 }
 0x71a   : > { %s2441_s13 = smov %s2136_s14  ;;  %s2442_s14 = smov %s2204_s21 }
 0x71b   : > { %s2443_s15 = smov %s2193_s18  ;;  %16 = sbr.rel (!%p14_p7) target bundleno = 4 (0x4), region = 72 }
 0x722   :  { %1482 = vsyncpa [#allocation3], 1 }
 0x723   :  { %1484 = vsyncpa [#allocation3 + $0x1], 1 }
 0x724   :  { %1485 = vsyncpa [#allocation4], 1 }
 0x725   :  { %1487 = vsyncpa [#allocation4 + $0x1], 1 }

</bundles_post_ra>
